<compile_context>
chip_gen: v7x
topology: tpu7x:2x2x1
jax: 0.10.0
libtpu: 0.0.40
codegen_flags: <defaults>
</compile_context>

<pallas_src>
import numpy as np

import jax
import jax.numpy as jnp
from jax.experimental import pallas as pl
from jax.experimental.pallas import tpu as pltpu


# ----------------------------------------------------------------------------
# Banded ("kn2row") weight construction (wrapper-side, one-time, tiny).
#   B[dy, wi, ci, wo, co] = w[dy, dx, ci, co]  with  wi = wo + dx - 1
#   (out-of-range wi omitted -> SAME zero padding along W is built in).
# ----------------------------------------------------------------------------
def _banded_conv_weights(w_hwio, W):
    kh, kw, Ci, Co = w_hwio.shape                       # (3, 3, Ci, Co)
    P = np.zeros((kw, W, W), np.float32)                # (dx, w_in, w_out)
    for dx in range(kw):
        for wo in range(W):
            wi = wo + dx - 1
            if 0 <= wi < W:
                P[dx, wi, wo] = 1.0
    # (dy, w_in, ci, w_out, co)
    return jnp.einsum('xiw,yxcf->yicwf', jnp.asarray(P), w_hwio)


def _interp_matrix(n_in, n_out):
    """Bilinear align_corners=True interpolation matrix (n_out, n_in)."""
    if n_in == 1:
        return jnp.ones((n_out, 1), jnp.float32)
    i = jnp.arange(n_out, dtype=jnp.float32)
    src = i * (n_in - 1) / (n_out - 1)
    lo = jnp.clip(jnp.floor(src).astype(jnp.int32), 0, n_in - 2)
    frac = src - lo.astype(jnp.float32)
    M = jnp.zeros((n_out, n_in), jnp.float32)
    M = M.at[jnp.arange(n_out), lo].add(1.0 - frac)
    M = M.at[jnp.arange(n_out), lo + 1].add(frac)
    return M


# ----------------------------------------------------------------------------
# Pallas kernel: fused [concat -> conv3x3 -> relu -> conv3x3 -> relu] per image
# ----------------------------------------------------------------------------
def _fused_double_conv(x1_2d, x2_2d, w1k, w2k, b1_row, b2_row):
    """x1_2d: (N,H,W*C1) bf16 skip, x2_2d: (N,H,(W/2)*C2) bf16 half-width upsampled.
    w1k: (3*(W*C1+(W/2)*C2), W*Cmid) bf16 banded weights (dy + concat halves folded
    into K, W-upsample folded in).  w2k: (3*W*Cmid, W*Cout) bf16.  Returns f32
    (N, H, W*Cout) lane-dense slab."""
    N, H, WC1 = x1_2d.shape
    WC2h = x2_2d.shape[-1]
    WCcat = WC1 + WC2h
    K1, WCm = w1k.shape
    K2, WCo = w2k.shape
    assert K1 == 3 * WCcat and K2 == 3 * WCm

    def kernel(x1_ref, x2_ref, w1_ref, w2_ref, b1_ref, b2_ref, out_ref):
        f32 = jnp.float32

        # Fused channel concat of the two inputs (never materialized in HBM).
        center = jnp.concatenate(
            [x1_ref[0].astype(f32), x2_ref[0].astype(f32)], axis=1)     # (H, WCcat)

        # In-register 1-row halo shifts (fused SAME padding along H).
        z1 = jnp.zeros((1, WCcat), f32)
        up = jnp.concatenate([z1, center[:H - 1, :]], axis=0)           # row h-1
        down = jnp.concatenate([center[1:, :], z1], axis=0)             # row h+1

        # conv1: dy + concat halves folded into K -> one big lane-dense dot.
        lhs1 = jnp.concatenate([up, center, down], axis=1).astype(jnp.bfloat16)
        mid = jnp.maximum(
            jnp.dot(lhs1, w1_ref[...], preferred_element_type=f32) + b1_ref[...],
            0.0)                                                        # (H, WCm) f32

        # conv2: same trick on relu(conv1), which stays in vregs (no staging).
        z2 = jnp.zeros((1, WCm), f32)
        up2 = jnp.concatenate([z2, mid[:H - 1, :]], axis=0)
        down2 = jnp.concatenate([mid[1:, :], z2], axis=0)
        lhs2 = jnp.concatenate([up2, mid, down2], axis=1).astype(jnp.bfloat16)
        out = jnp.maximum(
            jnp.dot(lhs2, w2_ref[...], preferred_element_type=f32) + b2_ref[...],
            0.0)                                                        # (H, WCo) f32

        # Lane-dense store: last dim is W*Cout (= 128 at the test shape).
        out_ref[0] = out.astype(out_ref.dtype)

    grid_spec = pltpu.PrefetchScalarGridSpec(
        num_scalar_prefetch=0,
        grid=(N,),
        in_specs=[
            pl.BlockSpec((1, H, WC1), lambda n: (n, 0, 0)),
            pl.BlockSpec((1, H, WC2h), lambda n: (n, 0, 0)),
            pl.BlockSpec((K1, WCm), lambda n: (0, 0)),
            pl.BlockSpec((K2, WCo), lambda n: (0, 0)),
            pl.BlockSpec((1, WCm), lambda n: (0, 0)),
            pl.BlockSpec((1, WCo), lambda n: (0, 0)),
        ],
        out_specs=pl.BlockSpec((1, H, WCo), lambda n: (n, 0, 0)),
    )

    return pl.pallas_call(
        kernel,
        out_shape=jax.ShapeDtypeStruct((N, H, WCo), jnp.float32),
        grid_spec=grid_spec,
        compiler_params=pltpu.CompilerParams(
            dimension_semantics=("parallel",),      # N=2 feeds both TCs on v7x
        ),
    )(x1_2d, x2_2d, w1k, w2k, b1_row, b2_row)


# ----------------------------------------------------------------------------
# Public module-equivalent forward (inputs in NCHW, like PyTorch)
# ----------------------------------------------------------------------------
@jax.jit
def unet_up_forward(inputs1_nchw, inputs2_nchw, w1, b1, w2, b2):
    N, C1, H, W = inputs1_nchw.shape
    C2, H2, W2 = inputs2_nchw.shape[1], inputs2_nchw.shape[2], inputs2_nchw.shape[3]
    Cmid = w1.shape[-1]
    Cout = w2.shape[-1]

    # Wrapper glue in bf16 (cuts transpose / upsample HBM bytes).
    x1 = jnp.transpose(inputs1_nchw.astype(jnp.bfloat16), (0, 2, 3, 1))   # (N,H,W,C1)
    x2 = jnp.transpose(inputs2_nchw.astype(jnp.bfloat16), (0, 2, 3, 1))   # (N,H2,W2,C2)

    # H-direction bilinear x2 upsample (align_corners=True).  The W-direction
    # interpolation is folded into the banded conv1 weights, so the kernel reads
    # inputs2 at HALF width.
    Mh = _interp_matrix(H2, H)                                            # (H, H2)
    x2h = jnp.einsum('oh,nhwc->nowc', Mh,
                     x2.astype(jnp.float32)).astype(jnp.bfloat16)         # (N,H,W2,C2)

    x1_2d = x1.reshape(N, H, W * C1)
    x2_2d = x2h.reshape(N, H, W2 * C2)

    # Banded weights: conv(cat(a,b)) = conv_a + conv_b via the channel split of w1;
    # dy folded along K; Mw (W-upsample) folded into the x2 half.
    Mw = _interp_matrix(W2, W)                                            # (W, W2)
    B1a = _banded_conv_weights(w1[:, :, :C1, :], W)          # (3, W,  C1, W, Cmid)
    B1b = _banded_conv_weights(w1[:, :, C1:, :], W)          # (3, W,  C2, W, Cmid)
    B1b = jnp.einsum('ywcvf,wu->yucvf', B1b, Mw)             # (3, W2, C2, W, Cmid)
    w1k = jnp.concatenate(
        [B1a.reshape(3, W * C1, W * Cmid), B1b.reshape(3, W2 * C2, W * Cmid)],
        axis=1).reshape(3 * (W * C1 + W2 * C2), W * Cmid).astype(jnp.bfloat16)
    w2k = _banded_conv_weights(w2, W).reshape(
        3 * W * Cmid, W * Cout).astype(jnp.bfloat16)

    # Channel biases tiled to the lane-flattened (w, c) layout, f32 epilogue.
    b1_row = jnp.tile(b1.astype(jnp.float32), W).reshape(1, W * Cmid)
    b2_row = jnp.tile(b2.astype(jnp.float32), W).reshape(1, W * Cout)

    out_2d = _fused_double_conv(x1_2d, x2_2d, w1k, w2k, b1_row, b2_row)
    out = out_2d.reshape(N, H, W, Cout)
    return jnp.transpose(out, (0, 3, 1, 2))                               # NCHW


# ----------------------------------------------------------------------------
# Pure f32 reference (exact PyTorch semantics: upsample -> concat -> 2x conv+relu)
# ----------------------------------------------------------------------------
def _upsample_x2_bilinear_nhwc(x):
    N, H, W, C = x.shape
    Mh = _interp_matrix(H, 2 * H)
    Mw = _interp_matrix(W, 2 * W)
    y = jnp.einsum('oh,nhwc->nowc', Mh, x)
    y = jnp.einsum('pw,nowc->nopc', Mw, y)
    return y


def _reference_forward(inputs1_nchw, inputs2_nchw, w1, b1, w2, b2):
    f32 = jnp.float32
    x1 = jnp.transpose(inputs1_nchw, (0, 2, 3, 1)).astype(f32)
    x2 = jnp.transpose(inputs2_nchw, (0, 2, 3, 1)).astype(f32)
    cat = jnp.concatenate([x1, _upsample_x2_bilinear_nhwc(x2)], axis=-1)
    dn = ('NHWC', 'HWIO', 'NHWC')
    y = jax.lax.conv_general_dilated(cat, w1.astype(f32), (1, 1), 'SAME',
                                     dimension_numbers=dn,
                                     precision=jax.lax.Precision.HIGHEST)
    y = jnp.maximum(y + b1.astype(f32), 0.0)
    y = jax.lax.conv_general_dilated(y, w2.astype(f32), (1, 1), 'SAME',
                                     dimension_numbers=dn,
                                     precision=jax.lax.Precision.HIGHEST)
    y = jnp.maximum(y + b2.astype(f32), 0.0)
    return jnp.transpose(y, (0, 3, 1, 2))


if __name__ == "__main__":
    # inputs1 (skip connection) at full resolution, inputs2 at half resolution.
    N, C1, H, W = 2, 4, 16, 16
    C2 = 8
    in_size = C1 + C2      # 12
    out_size = 8

    key = jax.random.PRNGKey(0)
    k1, k2, k3, k4, k5, k6 = jax.random.split(key, 6)

    inputs1 = jax.random.normal(k1, (N, C1, H, W), jnp.float32)
    inputs2 = jax.random.normal(k2, (N, C2, H // 2, W // 2), jnp.float32)

    # Parameters in HWIO layout, kaiming-ish scale.
    w1 = jax.random.normal(k3, (3, 3, in_size, out_size), jnp.float32) * 0.1
    b1 = jax.random.normal(k4, (out_size,), jnp.float32) * 0.1
    w2 = jax.random.normal(k5, (3, 3, out_size, out_size), jnp.float32) * 0.1
    b2 = jax.random.normal(k6, (out_size,), jnp.float32) * 0.1

    out = jax.block_until_ready(unet_up_forward(inputs1, inputs2, w1, b1, w2, b2))
    ref = jax.block_until_ready(_reference_forward(inputs1, inputs2, w1, b1, w2, b2))

    assert out.shape == (N, out_size, H, W), out.shape
    # Kernel uses bf16 MXU inputs/weights (and folds the W-interp into the weights),
    # compared against an exact f32 reference: observed error is a few 1e-3 RMS, so
    # 6e-2 absolute tolerance passes comfortably while any layout/tap/bias bug
    # (errors O(0.1 .. 1)) would still be caught.
    max_err = float(jnp.max(jnp.abs(out - ref)))
    assert max_err < 6e-2, f"max abs err = {max_err}"

    print("KERNEL_OK")
</pallas_src>

<mosaic_0001>
module attributes {stable_mosaic.version = 11 : i64} {
  func.func private @main(%arg0: i32) attributes {dimension_semantics = [#tpu.dimension_semantics<core_parallel>], iteration_bounds = array<i64: 2>, tpu.core_type = #tpu.core_type<sc_scalar_subcore>, window_params = []} {
    return
  }
}

module attributes {stable_mosaic.version = 11 : i64} {
  func.func private @main(%arg0: i32) attributes {dimension_semantics = [#tpu.dimension_semantics<core_parallel>], iteration_bounds = array<i64: 2>, tpu.core_type = #tpu.core_type<sc_scalar_subcore>, window_params = []} {
    return
  }
}

module attributes {stable_mosaic.version = 11 : i64} {
  func.func @kernel(%arg0: i32, %arg1: memref<1x16x64xbf16, #tpu.memory_space<vmem>>, %arg2: memref<1x16x64xbf16, #tpu.memory_space<vmem>>, %arg3: memref<384x128xbf16, #tpu.memory_space<vmem>>, %arg4: memref<384x128xbf16, #tpu.memory_space<vmem>>, %arg5: memref<1x128xf32, #tpu.memory_space<vmem>>, %arg6: memref<1x128xf32, #tpu.memory_space<vmem>>, %arg7: memref<1x16x128xf32, #tpu.memory_space<vmem>>) attributes {dimension_semantics = [#tpu.dimension_semantics<parallel>], iteration_bounds = array<i64: 2>, scalar_prefetch = 0 : i64, scratch_operands = 0 : i64, tpu.core_type = #tpu.core_type<tc>, window_params = [{transform_indices = @transform_0, window_bounds = array<i64: 1, 16, 64>}, {transform_indices = @transform_1, window_bounds = array<i64: 1, 16, 64>}, {pipeline_mode = #tpu.pipeline_mode<synchronous>, transform_indices = @transform_2, window_bounds = array<i64: 384, 128>}, {pipeline_mode = #tpu.pipeline_mode<synchronous>, transform_indices = @transform_3, window_bounds = array<i64: 384, 128>}, {pipeline_mode = #tpu.pipeline_mode<synchronous>, transform_indices = @transform_4, window_bounds = array<i64: 1, 128>}, {pipeline_mode = #tpu.pipeline_mode<synchronous>, transform_indices = @transform_5, window_bounds = array<i64: 1, 128>}, {transform_indices = @transform_6, window_bounds = array<i64: 1, 16, 128>}]} {
    %c0 = arith.constant 0 : index
    %c0_0 = arith.constant 0 : index
    %c0_1 = arith.constant 0 : index
    %0 = vector.load %arg1[%c0, %c0_0, %c0_1] : memref<1x16x64xbf16, #tpu.memory_space<vmem>>, vector<1x16x64xbf16>
    %1 = vector.shape_cast %0 : vector<1x16x64xbf16> to vector<16x64xbf16>
    %2 = arith.extf %1 : vector<16x64xbf16> to vector<16x64xf32>
    %c0_2 = arith.constant 0 : index
    %c0_3 = arith.constant 0 : index
    %c0_4 = arith.constant 0 : index
    %3 = vector.load %arg2[%c0_2, %c0_3, %c0_4] : memref<1x16x64xbf16, #tpu.memory_space<vmem>>, vector<1x16x64xbf16>
    %4 = vector.shape_cast %3 : vector<1x16x64xbf16> to vector<16x64xbf16>
    %5 = arith.extf %4 : vector<16x64xbf16> to vector<16x64xf32>
    %6 = tpu.concatenate %2, %5 in 1 : vector<16x64xf32>, vector<16x64xf32> -> vector<16x128xf32>
    %cst = arith.constant 0.000000e+00 : f32
    %7 = vector.broadcast %cst : f32 to vector<1x128xf32>
    %8 = vector.extract_strided_slice %6 {offsets = [0, 0], sizes = [15, 128], strides = [1, 1]} : vector<16x128xf32> to vector<15x128xf32>
    %9 = tpu.concatenate %7, %8 in 0 : vector<1x128xf32>, vector<15x128xf32> -> vector<16x128xf32>
    %10 = vector.extract_strided_slice %6 {offsets = [1, 0], sizes = [15, 128], strides = [1, 1]} : vector<16x128xf32> to vector<15x128xf32>
    %11 = tpu.concatenate %10, %7 in 0 : vector<15x128xf32>, vector<1x128xf32> -> vector<16x128xf32>
    %12 = tpu.concatenate %9, %6, %11 in 1 : vector<16x128xf32>, vector<16x128xf32>, vector<16x128xf32> -> vector<16x384xf32>
    %13 = arith.truncf %12 : vector<16x384xf32> to vector<16x384xbf16>
    %c0_5 = arith.constant 0 : index
    %c0_6 = arith.constant 0 : index
    %14 = vector.load %arg3[%c0_5, %c0_6] : memref<384x128xbf16, #tpu.memory_space<vmem>>, vector<384x128xbf16>
    %cst_7 = arith.constant dense<0.000000e+00> : vector<16x128xf32>
    %15 = tpu.matmul %13, %14, %cst_7 {dimension_numbers = #tpu.dot_dimension_numbers<[1], [0], [0], [1], [0, 0, 1, 1], [], []>} : vector<16x384xbf16>, vector<384x128xbf16>, vector<16x128xf32> -> vector<16x128xf32>
    %c0_8 = arith.constant 0 : index
    %c0_9 = arith.constant 0 : index
    %16 = vector.load %arg5[%c0_8, %c0_9] : memref<1x128xf32, #tpu.memory_space<vmem>>, vector<1x128xf32>
    %17 = vector.broadcast %16 : vector<1x128xf32> to vector<16x128xf32>
    %18 = arith.addf %15, %17 : vector<16x128xf32>
    %cst_10 = arith.constant 0.000000e+00 : f32
    %19 = vector.broadcast %cst_10 : f32 to vector<16x128xf32>
    %20 = arith.maximumf %18, %19 : vector<16x128xf32>
    %cst_11 = arith.constant 0.000000e+00 : f32
    %21 = vector.broadcast %cst_11 : f32 to vector<1x128xf32>
    %22 = vector.extract_strided_slice %20 {offsets = [0, 0], sizes = [15, 128], strides = [1, 1]} : vector<16x128xf32> to vector<15x128xf32>
    %23 = tpu.concatenate %21, %22 in 0 : vector<1x128xf32>, vector<15x128xf32> -> vector<16x128xf32>
    %24 = vector.extract_strided_slice %20 {offsets = [1, 0], sizes = [15, 128], strides = [1, 1]} : vector<16x128xf32> to vector<15x128xf32>
    %25 = tpu.concatenate %24, %21 in 0 : vector<15x128xf32>, vector<1x128xf32> -> vector<16x128xf32>
    %26 = tpu.concatenate %23, %20, %25 in 1 : vector<16x128xf32>, vector<16x128xf32>, vector<16x128xf32> -> vector<16x384xf32>
    %27 = arith.truncf %26 : vector<16x384xf32> to vector<16x384xbf16>
    %c0_12 = arith.constant 0 : index
    %c0_13 = arith.constant 0 : index
    %28 = vector.load %arg4[%c0_12, %c0_13] : memref<384x128xbf16, #tpu.memory_space<vmem>>, vector<384x128xbf16>
    %cst_14 = arith.constant dense<0.000000e+00> : vector<16x128xf32>
    %29 = tpu.matmul %27, %28, %cst_14 {dimension_numbers = #tpu.dot_dimension_numbers<[1], [0], [0], [1], [0, 0, 1, 1], [], []>} : vector<16x384xbf16>, vector<384x128xbf16>, vector<16x128xf32> -> vector<16x128xf32>
    %c0_15 = arith.constant 0 : index
    %c0_16 = arith.constant 0 : index
    %30 = vector.load %arg6[%c0_15, %c0_16] : memref<1x128xf32, #tpu.memory_space<vmem>>, vector<1x128xf32>
    %31 = vector.broadcast %30 : vector<1x128xf32> to vector<16x128xf32>
    %32 = arith.addf %29, %31 : vector<16x128xf32>
    %cst_17 = arith.constant 0.000000e+00 : f32
    %33 = vector.broadcast %cst_17 : f32 to vector<16x128xf32>
    %34 = arith.maximumf %32, %33 : vector<16x128xf32>
    %c0_18 = arith.constant 0 : index
    %c0_19 = arith.constant 0 : index
    %c0_20 = arith.constant 0 : index
    %35 = vector.load %arg7[%c0_18, %c0_19, %c0_20] : memref<1x16x128xf32, #tpu.memory_space<vmem>>, vector<1x16x128xf32>
    %36 = vector.shape_cast %35 : vector<1x16x128xf32> to vector<16x128xf32>
    %37 = vector.shape_cast %34 : vector<16x128xf32> to vector<1x16x128xf32>
    tpu.vector_store %arg7[%c0_18, %c0_19, %c0_20], %37 {strides = array<i32>} : memref<1x16x128xf32, #tpu.memory_space<vmem>>, vector<1x16x128xf32>,
    return
  }
  func.func @transform_0(%arg0: i32) -> (i32, i32, i32) {
    %c0_i32 = arith.constant 0 : i32
    %c0_i32_0 = arith.constant 0 : i32
    %c0_i32_1 = arith.constant 0 : i32
    return %arg0, %c0_i32, %c0_i32_0 : i32, i32, i32
  }
  func.func @transform_1(%arg0: i32) -> (i32, i32, i32) {
    %c0_i32 = arith.constant 0 : i32
    %c0_i32_0 = arith.constant 0 : i32
    %c0_i32_1 = arith.constant 0 : i32
    return %arg0, %c0_i32, %c0_i32_0 : i32, i32, i32
  }
  func.func @transform_2(%arg0: i32) -> (i32, i32) {
    %c0_i32 = arith.constant 0 : i32
    %c0_i32_0 = arith.constant 0 : i32
    %c0_i32_1 = arith.constant 0 : i32
    return %c0_i32, %c0_i32_0 : i32, i32
  }
  func.func @transform_3(%arg0: i32) -> (i32, i32) {
    %c0_i32 = arith.constant 0 : i32
    %c0_i32_0 = arith.constant 0 : i32
    %c0_i32_1 = arith.constant 0 : i32
    return %c0_i32, %c0_i32_0 : i32, i32
  }
  func.func @transform_4(%arg0: i32) -> (i32, i32) {
    %c0_i32 = arith.constant 0 : i32
    %c0_i32_0 = arith.constant 0 : i32
    %c0_i32_1 = arith.constant 0 : i32
    return %c0_i32, %c0_i32_0 : i32, i32
  }
  func.func @transform_5(%arg0: i32) -> (i32, i32) {
    %c0_i32 = arith.constant 0 : i32
    %c0_i32_0 = arith.constant 0 : i32
    %c0_i32_1 = arith.constant 0 : i32
    return %c0_i32, %c0_i32_0 : i32, i32
  }
  func.func @transform_6(%arg0: i32) -> (i32, i32, i32) {
    %c0_i32 = arith.constant 0 : i32
    %c0_i32_0 = arith.constant 0 : i32
    %c0_i32_1 = arith.constant 0 : i32
    return %arg0, %c0_i32, %c0_i32_0 : i32, i32, i32
  }
}

</mosaic_0001>

<bundles_post_ra>
// kernel: tile.13
= control target key start
LH: loop header
LB: loop body
LE: loop exit
PB: predicated region body
PF: predicated region fallthrough
CT: control target
= control target key end

     0   :  { %s28_s0 = inlined_call_operand.vmem [shape: f32[8], index: 0, kind: input, shape index: {}]   ;;  %s29_s1 = inlined_call_operand.vmem [shape: f32[16,8], index: 1, kind: output, shape index: {}]  }
   0x1   :  { %v4_v0 = vld [vmem:[%s28_s0] ss:$0 sm:$0xff] }
   0x2   :  { %5 = vst [vmem:[%s29_s1] sm:$0xff] %v4_v0  ;;  %8 = vst [vmem:[%s29_s1 + $0x8] sm:$0xff] %v4_v0 }

// kernel: tile.14
= control target key start
LH: loop header
LB: loop body
LE: loop exit
PB: predicated region body
PF: predicated region fallthrough
CT: control target
= control target key end

     0   :  { %s131_s10 = smov 120   ;;  %s132_s11 = smov 104   ;;  %vm3_vm0 = vcmask 64512   ;;  %vm9_vm1 = vcmask 1048512   ;;  %vm15_vm2 = vcmask 982912   ;;  %vm21_vm3 = vcmask 917312   ;;  %s207_s0 = inlined_call_operand.vmem [shape: f32[16,8], index: 0, kind: input, shape index: {}]   ;;  %s208_s1 = inlined_call_operand.vmem [shape: f32[1,128], index: 1, kind: output, shape index: {}]  }
   0x1   :  { %v101_v0 = vld [vmem:[%s207_s0 + $0xf] sm:$0x1]   ;;  %v103_v1 = vld [vmem:[%s207_s0 + $0xd] sm:$0x1]   ;;  %v102_v2 = vld [vmem:[%s207_s0 + $0xe] sm:$0x1]  }
   0x2   :  { %7 = vrot.lane.b32.xlu0 %v101_v0, %s131_s10  ;;  %19 = vrot.lane.b32.xlu1 %v103_v1, %s132_s11  ;;  %v104_v3 = vld [vmem:[%s207_s0 + $0xc] sm:$0x1]   ;;  %s133_s16 = smov 112   ;;  %s134_s17 = smov 96   ;;  %v105_v4 = vld [vmem:[%s207_s0 + $0xb] sm:$0x1]  }
   0x3   :  { %v106_v5 = vld [vmem:[%s207_s0 + $0xa] sm:$0x1]   ;;  %v2_v6 = vld [vmem:[%s207_s0] sm:$0x1]   ;;  %s135_s24 = smov 88   ;;  %s136_s25 = smov 80  }
   0x4   :  { %4 = vst.msk [vmem:[#allocation0] sm:$0x1] %vm3_vm0, %v2_v6   ;;  %v107_v7 = vld [vmem:[%s207_s0 + $0x9] sm:$0x1]   ;;  %v108_v8 = vld [vmem:[%s207_s0 + $0x8] sm:$0x1]  }
   0x5   :  { %s137_s30 = smov 72   ;;  %s138_s2 = smov 64   ;;  %v109_v9 = vld [vmem:[%s207_s0 + $0x7] sm:$0x1]   ;;  %v110_v10 = vld [vmem:[%s207_s0 + $0x6] sm:$0x1]  }
   0x6   :  { %13 = vrot.lane.b32.xlu0 %v102_v2, %s133_s16  ;;  %25 = vrot.lane.b32.xlu1 %v104_v3, %s134_s17  ;;  %s139_s7 = smov 56   ;;  %s140_s8 = smov 48   ;;  %v111_v11 = vld [vmem:[%s207_s0 + $0x5] sm:$0x1]   ;;  %v112_v12 = vld [vmem:[%s207_s0 + $0x4] sm:$0x1]  }
   0x7   :  { %s141_s13 = smov 40   ;;  %s142_s14 = smov 32   ;;  %v113_v13 = vld [vmem:[%s207_s0 + $0x3] sm:$0x1]   ;;  %v114_v14 = vld [vmem:[%s207_s0 + $0x2] sm:$0x1]  }
   0x8   :  { %s143_s19 = smov 24   ;;  %s144_s20 = smov 16   ;;  %v115_v15 = vld [vmem:[%s207_s0 + $0x1] sm:$0x1]   ;;  %vm27_vm4 = vcmask 851712   ;;  %vm33_vm5 = vcmask 786112  }
   0x9   :  { %s145_s0 = smov 8   ;;  %vm39_vm6 = vcmask 720512   ;;  %vm45_vm7 = vcmask 654912   ;;  %vm51_vm8 = vcmask 589312   ;;  %vm57_vm9 = vcmask 523712  }
   0xa   :  { %31 = vrot.lane.b32.xlu0 %v105_v4, %s135_s24  ;;  %37 = vrot.lane.b32.xlu1 %v106_v5, %s136_s25  ;;  %vm63_vm10 = vcmask 458112   ;;  %vm69_vm11 = vcmask 392512   ;;  %vm75_vm12 = vcmask 326912   ;;  %vm81_vm13 = vcmask 261312  }
   0xb   :  { %vm87_vm14 = vcmask 195712   ;;  %vm93_vm15 = vcmask 130112  }
   0xe   :  { %43 = vrot.lane.b32.xlu0 %v107_v7, %s137_s30  ;;  %49 = vrot.lane.b32.xlu1 %v108_v8, %s138_s2 }
  0x12   :  { %55 = vrot.lane.b32.xlu0 %v109_v9, %s139_s7  ;;  %61 = vrot.lane.b32.xlu1 %v110_v10, %s140_s8 }
  0x16   :  { %67 = vrot.lane.b32.xlu0 %v111_v11, %s141_s13  ;;  %73 = vrot.lane.b32.xlu1 %v112_v12, %s142_s14 }
  0x1a   :  { %79 = vrot.lane.b32.xlu0 %v113_v13, %s143_s19  ;;  %85 = vrot.lane.b32.xlu1 %v114_v14, %s144_s20 }
  0x1e   :  { %91 = vrot.lane.b32.xlu0 %v115_v15, %s145_s0 }
  0x74   :  { %v8_v16 = vpop.permute.xlu0 %7   ;;  %v20_v17 = vpop.permute.xlu1 %19  }
  0x75   :  { %10 = vst.msk [vmem:[#allocation0] sm:$0x1] %vm9_vm1, %v8_v16  }
  0x78   :  { %v14_v18 = vpop.permute.xlu0 %13   ;;  %v26_v19 = vpop.permute.xlu1 %25  }
  0x79   :  { %16 = vst.msk [vmem:[#allocation0] sm:$0x1] %vm15_vm2, %v14_v18  }
  0x7a   :  { %22 = vst.msk [vmem:[#allocation0] sm:$0x1] %vm21_vm3, %v20_v17  }
  0x7b   :  { %28 = vst.msk [vmem:[#allocation0] sm:$0x1] %vm27_vm4, %v26_v19  }
  0x7c   :  { %v32_v20 = vpop.permute.xlu0 %31   ;;  %v38_v21 = vpop.permute.xlu1 %37  }
  0x7d   :  { %34 = vst.msk [vmem:[#allocation0] sm:$0x1] %vm33_vm5, %v32_v20  }
  0x7e   :  { %40 = vst.msk [vmem:[#allocation0] sm:$0x1] %vm39_vm6, %v38_v21  }
  0x80   :  { %v44_v22 = vpop.permute.xlu0 %43   ;;  %v50_v23 = vpop.permute.xlu1 %49  }
  0x81   :  { %46 = vst.msk [vmem:[#allocation0] sm:$0x1] %vm45_vm7, %v44_v22  }
  0x82   :  { %52 = vst.msk [vmem:[#allocation0] sm:$0x1] %vm51_vm8, %v50_v23  }
  0x84   :  { %v56_v24 = vpop.permute.xlu0 %55   ;;  %v62_v25 = vpop.permute.xlu1 %61  }
  0x85   :  { %58 = vst.msk [vmem:[#allocation0] sm:$0x1] %vm57_vm9, %v56_v24  }
  0x86   :  { %64 = vst.msk [vmem:[#allocation0] sm:$0x1] %vm63_vm10, %v62_v25  }
  0x88   :  { %v68_v26 = vpop.permute.xlu0 %67   ;;  %v74_v27 = vpop.permute.xlu1 %73  }
  0x89   :  { %70 = vst.msk [vmem:[#allocation0] sm:$0x1] %vm69_vm11, %v68_v26  }
  0x8a   :  { %76 = vst.msk [vmem:[#allocation0] sm:$0x1] %vm75_vm12, %v74_v27  }
  0x8c   :  { %v80_v28 = vpop.permute.xlu0 %79   ;;  %v86_v29 = vpop.permute.xlu1 %85  }
  0x8d   :  { %82 = vst.msk [vmem:[#allocation0] sm:$0x1] %vm81_vm13, %v80_v28  }
  0x8e   :  { %88 = vst.msk [vmem:[#allocation0] sm:$0x1] %vm87_vm14, %v86_v29  }
  0x90   :  { %v92_v30 = vpop.permute.xlu0 %91  }
  0x91   :  { %94 = vst.msk [vmem:[#allocation0] sm:$0x1] %vm93_vm15, %v92_v30  }
  0x98   :  { %v98_v31 = vld [vmem:[#allocation0] sm:$0x1] }
  0x99   :  { %100 = vst [vmem:[%s208_s1] sm:$0x1] %v98_v31 }

// kernel: unet_up_forward.1
= control target key start
LH: loop header
LB: loop body
LE: loop exit
PB: predicated region body
PF: predicated region fallthrough
CT: control target
= control target key end

     0   :  { %s1265_s21 = smov 0   ;;  %s1485_s0 = inlined_call_operand.vmem [shape: bf16[2,16,64], index: 0, kind: input, shape index: {}]   ;;  %s1486_s1 = inlined_call_operand.vmem [shape: bf16[2,16,64], index: 1, kind: input, shape index: {}]   ;;  %s1487_s2 = inlined_call_operand.vmem [shape: bf16[384,128], index: 2, kind: input, shape index: {}]   ;;  %s1488_s3 = inlined_call_operand.vmem [shape: bf16[384,128], index: 3, kind: input, shape index: {}]   ;;  %s1489_s4 = inlined_call_operand.vmem [shape: f32[1,128], index: 4, kind: input, shape index: {}]   ;;  %s1490_s5 = inlined_call_operand.vmem [shape: f32[1,128], index: 5, kind: input, shape index: {}]   ;;  %s1491_s6 = inlined_call_operand.vmem [shape: f32[2,16,128], index: 6, kind: output, shape index: {}]  }
   0x1 LB: > { %s963_s22 = sadd.s32 4294967295, %s1224_s21   ;;  %p967_p0 = scmp.ge.s32.totalorder %s1224_s21, 1  ;;  %s1224_s21 = sphi %s1265_s21, %s16_s21  }
   0x2   : > { %p222_p1 = scmp.lt.s32.totalorder %s1224_s21, 3 }
   0x4   : > { %p223_p2 = pnand %p967_p0, %p222_p1 }
   0x5   : > { %p257_p3 = scmp.lt.s32.totalorder (!%p223_p2), %s963_s22, 1  ;;  %v1170_v0 = vld [vmem:[%s1487_s2 + $0x40] sm:$0xff] (!%p223_p2)   ;;  %v1226_v1 = vmov (!%p223_p2), 0.0   ;;  %v1173_v4 = vld [vmem:[%s1487_s2 + $0x48] sm:$0xff] (!%p223_p2)   ;;  %v1176_v10 = vld [vmem:[%s1487_s2 + $0x50] sm:$0xff] (!%p223_p2)   ;;  %vm1227_vm0 = vmmov (!%p223_p2), 0  }
   0x6   : > { %226 = sbr.rel (%p223_p2) target bundleno = 596 (0x254), region = 44  ;;  %1113 = vmatprep.subr.bf16.mxu1 (!%p223_p2), %v1226_v1  ;;  %v1171_v2 = vld [vmem:[%s1487_s2] sm:$0xff] (!%p223_p2)   ;;  %1051 = vmatprep.subr.bf16.mxu0 (!%p223_p2), %v1170_v0  ;;  %v1174_v5 = vld [vmem:[%s1487_s2 + $0x8] sm:$0xff] (!%p223_p2)   ;;  %v1177_v11 = vld [vmem:[%s1487_s2 + $0x10] sm:$0xff] (!%p223_p2)   ;;  %s1228_s25 = smov (!%p223_p2), 64   ;;  %vm294_vm1 = vcmask (!%p223_p2), 1040384  }
   0x7   : > { %v1172_v3 = vld [vmem:[%s1487_s2 + $0x80] sm:$0xff] (!%p223_p2)   ;;  %1052 = vmatpush3.bf16.msra.mxu0 (!%p223_p2), %v1171_v2  ;;  %v1175_v7 = vld [vmem:[%s1487_s2 + $0x88] sm:$0xff] (!%p223_p2)   ;;  %1129 = vmatprep.mubr.msk.bf16.mxu1 (!%p223_p2), %vm1227_vm0, %v1226_v1  ;;  %v1178_v13 = vld [vmem:[%s1487_s2 + $0x90] sm:$0xff] (!%p223_p2)   ;;  %vm289_vm2 = vcmask (!%p223_p2), 523264   ;;  %vm301_vm4 = vcmask (!%p223_p2), 1046528   ;;  %vm1229_vm5 = vmmov (!%p223_p2), 1  }
   0x8   : > { %1114 = vmatpush3.bf16.msra.mxu1 (!%p223_p2), %v1172_v3  ;;  %1053 = vmatprep.subr.bf16.mxu0 (!%p223_p2), %v1173_v4  ;;  %v1179_v14 = vld [vmem:[%s1487_s2 + $0x58] sm:$0xff] (!%p223_p2)   ;;  %v1182_v17 = vld [vmem:[%s1487_s2 + $0x60] sm:$0xff] (!%p223_p2)   ;;  %v1185_v20 = vld [vmem:[%s1487_s2 + $0x68] sm:$0xff] (!%p223_p2)  }
   0x9   : > { %1115 = vmatprep.subr.bf16.mxu1 (!%p223_p2), %v1226_v1  ;;  %v1180_v15 = vld [vmem:[%s1487_s2 + $0x18] sm:$0xff] (!%p223_p2)   ;;  %v1183_v18 = vld [vmem:[%s1487_s2 + $0x20] sm:$0xff] (!%p223_p2)   ;;  %v1186_v21 = vld [vmem:[%s1487_s2 + $0x28] sm:$0xff] (!%p223_p2)  }
   0xa   : > { %v1181_v16 = vld [vmem:[%s1487_s2 + $0x98] sm:$0xff] (!%p223_p2)   ;;  %v1184_v19 = vld [vmem:[%s1487_s2 + $0xa0] sm:$0xff] (!%p223_p2)   ;;  %v1187_v22 = vld [vmem:[%s1487_s2 + $0xa8] sm:$0xff] (!%p223_p2)  }
   0xb   : > { %1054 = vmatpush3.bf16.msra.mxu0 (!%p223_p2), %v1174_v5  ;;  %v1188_v23 = vld [vmem:[%s1487_s2 + $0x70] sm:$0xff] (!%p223_p2)   ;;  %v1191_v26 = vld [vmem:[%s1487_s2 + $0x78] sm:$0xff] (!%p223_p2)   ;;  %v1194_v29 = vld [vmem:[%s1488_s3 + $0x40] sm:$0xff] (!%p223_p2)  }
   0xc   : > { %1116 = vmatpush3.bf16.msra.mxu1 (!%p223_p2), %v1175_v7  ;;  %1055 = vmatprep.subr.bf16.mxu0 (!%p223_p2), %v1176_v10  ;;  %v1189_v24 = vld [vmem:[%s1487_s2 + $0x30] sm:$0xff] (!%p223_p2)   ;;  %v1192_v27 = vld [vmem:[%s1487_s2 + $0x38] sm:$0xff] (!%p223_p2)   ;;  %vm999_vm3 = vmneg (!%p223_p2), %vm294_vm1 }
   0xd   : > { %s1497_s22 = smov (!%p257_p3, %s963_s22), 1  ;;  %1117 = vmatprep.subr.bf16.mxu1 %v1226_v1  ;;  %v1190_v25 = vld [vmem:[%s1487_s2 + $0xb0] sm:$0xff]   ;;  %v1193_v28 = vld [vmem:[%s1487_s2 + $0xb8] sm:$0xff]   ;;  %vm1373_vm6 = vmpackc.low %vm1229_vm5, %vm999_vm3 }
   0xe   : > { %s1040_s29 = sshll.u32 %s1497_s22, 3  ;;  %vm1380_vm7 = vmpackc.low %vm301_vm4, %vm1229_vm5  ;;  %v1195_v47 = vld [vmem:[%s1488_s3] sm:$0xff]   ;;  %v1197_v51 = vld [vmem:[%s1488_s3 + $0x48] sm:$0xff]   ;;  %s1042_s20 = sshll.u32 %s1497_s22, 4 }
   0xf   : > { %s266_s10 = scalar_lea.vmem %s1486_s1, %s1040_s29  ;;  %1056 = vmatpush3.bf16.msra.mxu0 %v1177_v11  ;;  %s261_s14 = scalar_lea.vmem %s1485_s0, %s1040_s29  ;;  %v1196_v48 = vld [vmem:[%s1488_s3 + $0x80] sm:$0xff]   ;;  %v1198_v52 = vld [vmem:[%s1488_s3 + $0x8] sm:$0xff]   ;;  %v1200_v54 = vld [vmem:[%s1488_s3 + $0x50] sm:$0xff]  }
  0x10   : > { %v1048_v6 = vld [vmem:[%s266_s10] sm:$0xff]   ;;  %1118 = vmatpush3.bf16.msra.mxu1 %v1178_v13  ;;  %1057 = vmatprep.subr.bf16.mxu0 %v1179_v14  ;;  %v1199_v53 = vld [vmem:[%s1488_s3 + $0x88] sm:$0xff]   ;;  %v1201_v55 = vld [vmem:[%s1488_s3 + $0x10] sm:$0xff]  }
  0x11   : > { %v1049_v8 = vunpack.c.l.bf16 %v1048_v6  ;;  %v1050_v9 = vunpack.c.h.bf16 %v1048_v6  ;;  %1119 = vmatprep.subr.bf16.mxu1 %v1226_v1  ;;  %v1044_v30 = vld [vmem:[%s261_s14] sm:$0xff]   ;;  %v1202_v56 = vld [vmem:[%s1488_s3 + $0x90] sm:$0xff]   ;;  %v1203_v57 = vld [vmem:[%s1488_s3 + $0x58] sm:$0xff]  }
  0x12   : > { %v1045_v31 = vunpack.c.l.bf16 %v1044_v30  ;;  %v1046_v32 = vunpack.c.h.bf16 %v1044_v30  ;;  %v1204_v58 = vld [vmem:[%s1488_s3 + $0x18] sm:$0xff]   ;;  %v1206_v60 = vld [vmem:[%s1488_s3 + $0x60] sm:$0xff]   ;;  %v1209_v63 = vld [vmem:[%s1488_s3 + $0x68] sm:$0xff]  }
  0x13   : > { %v1165_v12 = vpack.i.bf16 %v1050_v9, %v1049_v8  ;;  %1058 = vmatpush3.bf16.msra.mxu0 %v1180_v15  ;;  %v1205_v59 = vld [vmem:[%s1488_s3 + $0x98] sm:$0xff]   ;;  %v1207_v61 = vld [vmem:[%s1488_s3 + $0x20] sm:$0xff]   ;;  %v1210_v0 = vld [vmem:[%s1488_s3 + $0x28] sm:$0xff]  }
  0x14   : > { %1120 = vmatpush3.bf16.msra.mxu1 %v1181_v16  ;;  %1059 = vmatprep.subr.bf16.mxu0 %v1182_v17  ;;  %v1208_v62 = vld [vmem:[%s1488_s3 + $0xa0] sm:$0xff]   ;;  %v1211_v2 = vld [vmem:[%s1488_s3 + $0xa8] sm:$0xff]   ;;  %v1212_v3 = vld [vmem:[%s1488_s3 + $0x70] sm:$0xff]  }
  0x15   : > { %1166 = vrot.lane.b32.xlu0 %v1165_v12, %s1228_s25  ;;  %1121 = vmatprep.subr.bf16.mxu1 %v1226_v1  ;;  %v1213_v4 = vld [vmem:[%s1488_s3 + $0x30] sm:$0xff]   ;;  %v1215_v6 = vld [vmem:[%s1488_s3 + $0x78] sm:$0xff]   ;;  %v974_v11 = vld [vmem:[%s1489_s4] ss:$0 sm:$0xff]  ;;  %s271_s25 = scalar_lea.vmem %s1491_s6, %s1042_s20 }
  0x16   : > { %v1214_v5 = vld [vmem:[%s1488_s3 + $0xb0] sm:$0xff]   ;;  %v1216_v7 = vld [vmem:[%s1488_s3 + $0x38] sm:$0xff]  }
  0x17   : > { %1060 = vmatpush3.bf16.msra.mxu0 %v1183_v18  ;;  %v1217_v8 = vld [vmem:[%s1488_s3 + $0xb8] sm:$0xff]  }
  0x18   : > { %1122 = vmatpush3.bf16.msra.mxu1 %v1184_v19  ;;  %1061 = vmatprep.subr.bf16.mxu0 %v1185_v20 }
  0x19   : > { %1123 = vmatprep.subr.bf16.mxu1 %v1226_v1 }
  0x1b   : > { %1062 = vmatpush3.bf16.msra.mxu0 %v1186_v21 }
  0x1c   : > { %1124 = vmatpush3.bf16.msra.mxu1 %v1187_v22  ;;  %1063 = vmatprep.subr.bf16.mxu0 %v1188_v23 }
  0x1d   : > { %1125 = vmatprep.subr.bf16.mxu1 %v1226_v1 }
  0x1f   : > { %1064 = vmatpush3.bf16.msra.mxu0 %v1189_v24 }
  0x20   : > { %1126 = vmatpush3.bf16.msra.mxu1 %v1190_v25  ;;  %1065 = vmatprep.subr.bf16.mxu0 %v1191_v26 }
  0x21   : > { %1127 = vmatprep.subr.bf16.mxu1 %v1226_v1 }
  0x23   : > { %1066 = vmatpush3.bf16.msra.mxu0 %v1192_v27 }
  0x24   : > { %1128 = vmatpush3.bf16.msra.mxu1 %v1193_v28  ;;  %1082 = vmatprep.subr.bf16.mxu0 %v1194_v29 }
  0x25   : > { %1133 = vmatprep.subr.bf16.mxu1 %v1226_v1 }
  0x87   : > { %v1167_v33 = vpop.permute.xlu0 %1166 }
  0x88   : > { %v1169_v34 = vunpack.i.h.bf16 %v1167_v33  ;;  %v1168_v35 = vunpack.i.l.bf16 %v1167_v33 }
  0x8a   : > { %v290_v36 = vsel %vm289_vm2, %v1045_v31, %v1168_v35  ;;  %v291_v37 = vsel %vm289_vm2, %v1046_v32, %v1169_v34 }
  0x8b   : > { %v295_v38 = vrot.slane %v290_v36, 7  ;;  %v296_v39 = vrot.slane %v291_v37, 7  ;;  %v302_v40 = vrot.slane %v290_v36, 1  ;;  %v303_v41 = vrot.slane %v291_v37, 1 }
  0x8c   : > { %v309_v42 = vpack.c.bf16 %v291_v37, %v290_v36  ;;  %v1006_v36 = vld [vmem:[%s1490_s5] ss:$0 sm:$0xff] }
  0x8d   : > { %v297_v44 = vsel %vm294_vm1, %v295_v38, %v296_v39  ;;  %v304_v45 = vsel %vm301_vm4, %v302_v40, %v303_v41 }
  0x8e   : > { %542 = vmatprep.mubr.bf16.mxu0 %v309_v42  ;;  %v1001_v49 = vpack.c.bf16 %v297_v44, %v295_v38  ;;  %v1004_v50 = vpack.c.bf16 %v303_v41, %v304_v45 }
  0x90   : > { %1002 = vmatmul.mubr.msk.bf16.vlgmr.msra.gmra.mrb[0].mxu0 %vm1373_vm6, %v1001_v49  ;;  %1130 = vmatmul.mubr.msk.bf16.vlgmr.msra.gmra.mrb[0].mxu1 %vm1380_vm7, %v1004_v50 }
  0x91   : > { %1083 = vmatpush3.bf16.msra.mxu0 %v1195_v47  ;;  %1134 = vmatpush3.bf16.msra.mxu1 %v1196_v48 }
  0x92   : > { %1084 = vmatprep.subr.bf16.mxu0 %v1197_v51  ;;  %1135 = vmatprep.subr.bf16.mxu1 %v1226_v1 }
  0x93   : > { %1149 = vmatprep.mubr.msk.bf16.mxu1 %vm1227_vm0, %v1226_v1 }
  0x95   : > { %1085 = vmatpush3.bf16.msra.mxu0 %v1198_v52  ;;  %1136 = vmatpush3.bf16.msra.mxu1 %v1199_v53 }
  0x96   : > { %1086 = vmatprep.subr.bf16.mxu0 %v1200_v54  ;;  %1137 = vmatprep.subr.bf16.mxu1 %v1226_v1 }
  0x99   : > { %1087 = vmatpush3.bf16.msra.mxu0 %v1201_v55  ;;  %1138 = vmatpush3.bf16.msra.mxu1 %v1202_v56 }
  0x9a   : > { %1088 = vmatprep.subr.bf16.mxu0 %v1203_v57  ;;  %1139 = vmatprep.subr.bf16.mxu1 %v1226_v1 }
  0x9d   : > { %1089 = vmatpush3.bf16.msra.mxu0 %v1204_v58  ;;  %1140 = vmatpush3.bf16.msra.mxu1 %v1205_v59 }
  0x9e   : > { %1141 = vmatprep.subr.bf16.mxu1 %v1226_v1  ;;  %1090 = vmatprep.subr.bf16.mxu0 %v1206_v60 }
  0xa1   : > { %1091 = vmatpush3.bf16.msra.mxu0 %v1207_v61  ;;  %1142 = vmatpush3.bf16.msra.mxu1 %v1208_v62 }
  0xa2   : > { %1143 = vmatprep.subr.bf16.mxu1 %v1226_v1  ;;  %1092 = vmatprep.subr.bf16.mxu0 %v1209_v63 }
  0xa5   : > { %1093 = vmatpush3.bf16.msra.mxu0 %v1210_v0  ;;  %1144 = vmatpush3.bf16.msra.mxu1 %v1211_v2 }
  0xa6   : > { %1145 = vmatprep.subr.bf16.mxu1 %v1226_v1  ;;  %1094 = vmatprep.subr.bf16.mxu0 %v1212_v3 }
  0xa9   : > { %1095 = vmatpush3.bf16.msra.mxu0 %v1213_v4  ;;  %1146 = vmatpush3.bf16.msra.mxu1 %v1214_v5 }
  0xaa   : > { %1147 = vmatprep.subr.bf16.mxu1 %v1226_v1  ;;  %1096 = vmatprep.subr.bf16.mxu0 %v1215_v6 }
  0xad   : > { %1097 = vmatpush3.bf16.msra.mxu0 %v1216_v7  ;;  %1148 = vmatpush3.bf16.msra.mxu1 %v1217_v8 }
 0x163   : > { %v1067_v9 = vpop.f32.mrb[0].mxu0  ;;  %v585_v10 = vpop.f32.mrb[0].mxu1 }
 0x164   : > { %v1068_v12 = vpop.f32.mrb[1].mxu0  ;;  %v1131_v13 = vpop.f32.mrb[1].mxu1 }
 0x165   : > { %v1069_v1 = vadd.f32 %v1068_v12, %v1067_v9  ;;  %v1070_v14 = vpop.f32.mrb[2].mxu0  ;;  %v588_v15 = vpop.f32.mrb[2].mxu1 }
 0x166   : > { %v1071_v16 = vpop.f32.mrb[3].mxu0  ;;  %v1132_v17 = vpop.f32.mrb[3].mxu1 }
 0x167   : > { %v545_v18 = vadd.f32 %v1069_v1, %v974_v11  ;;  %v1072_v19 = vadd.f32 %v1071_v16, %v1070_v14 }
 0x169   : > { %v586_v20 = vadd.f32 %v585_v10, %v545_v18  ;;  %v548_v21 = vadd.f32 %v1072_v19, %v974_v11 }
 0x16b   : > { %v592_v22 = vmax.f32 %v586_v20, 0.0  ;;  %v589_v23 = vadd.f32 %v588_v15, %v548_v21 }
 0x16d   : > { %v593_v24 = vmax.f32 %v589_v23, 0.0  ;;  %v596_v25 = vrot.slane %v592_v22, 7  ;;  %v602_v26 = vrot.slane %v592_v22, 1 }
 0x16f   : > { %v597_v27 = vrot.slane %v593_v24, 7  ;;  %v603_v28 = vrot.slane %v593_v24, 1  ;;  %v609_v29 = vpack.c.bf16 %v593_v24, %v592_v22 }
 0x171   : > { %v604_v30 = vsel %vm301_vm4, %v602_v26, %v603_v28  ;;  %842 = vmatprep.mubr.bf16.mxu0 %v609_v29  ;;  %v598_v31 = vsel %vm294_vm1, %v596_v25, %v597_v27 }
 0x172   : > { %v1036_v32 = vpack.c.bf16 %v603_v28, %v604_v30  ;;  %v1033_v33 = vpack.c.bf16 %v598_v31, %v596_v25 }
 0x174   : > { %1034 = vmatmul.mubr.msk.bf16.vlgmr.msra.gmra.mrb[4].mxu0 %vm1373_vm6, %v1033_v33  ;;  %1150 = vmatmul.mubr.msk.bf16.vlgmr.msra.gmra.mrb[4].mxu1 %vm1380_vm7, %v1036_v32 }
 0x247   : > { %v1098_v34 = vpop.f32.mrb[4].mxu0  ;;  %v885_v35 = vpop.f32.mrb[4].mxu1 }
 0x248   : > { %v1099_v37 = vpop.f32.mrb[5].mxu0  ;;  %v1151_v38 = vpop.f32.mrb[5].mxu1 }
 0x249   : > { %v1100_v39 = vadd.f32 %v1099_v37, %v1098_v34  ;;  %v1101_v40 = vpop.f32.mrb[6].mxu0  ;;  %v888_v41 = vpop.f32.mrb[6].mxu1 }
 0x24a   : > { %v1102_v42 = vpop.f32.mrb[7].mxu0  ;;  %v1152_v44 = vpop.f32.mrb[7].mxu1 }
 0x24b   : > { %v845_v45 = vadd.f32 %v1100_v39, %v1006_v36  ;;  %v1103_v43 = vadd.f32 %v1102_v42, %v1101_v40 }
 0x24d   : > { %v886_v47 = vadd.f32 %v885_v35, %v845_v45  ;;  %v848_v48 = vadd.f32 %v1103_v43, %v1006_v36 }
 0x24f   : > { %v892_v46 = vmax.f32 %v886_v47, 0.0  ;;  %v889_v49 = vadd.f32 %v888_v41, %v848_v48 }
 0x251   : > { %894 = vst [vmem:[%s271_s25] sm:$0xff] %v892_v46  ;;  %v893_v50 = vmax.f32 %v889_v49, 0.0 }
 0x253   : > { %895 = vst [vmem:[%s271_s25 + $0x8] sm:$0xff] %v893_v50 }
 0x254 PF: > { %s16_s21 = sadd.s32 1, %s1224_s21  }
 0x255   : > { %p13_p4 = scmp.ge.s32.totalorder %s16_s21, 4  }
 0x257   :  { %15 = sbr.rel (!%p13_p4) target bundleno = 1 (0x1), region = 77 }

</bundles_post_ra>
